<compile_context>
chip_gen: v5e
topology: v5e:2x2
jax: 0.10.0
libtpu: 0.0.40
codegen_flags: <defaults>
</compile_context>

<pallas_src>
import jax
import jax.numpy as jnp
from jax.experimental import pallas as pl
from jax.experimental.pallas import tpu as pltpu


_LANE = 128
_SUBLANE = 8


def _cdiv(a, b):
    return (a + b - 1) // b


def _round_up(a, b):
    return _cdiv(a, b) * b


def _make_mlp_kernel(num_layers):
    """Fused kernel: x -> (Linear, ReLU) * (L-1) -> Linear.

    refs layout: w0, b0, w1, b1, ..., w_{L-1}, b_{L-1}, out_ref.
    Weights stay in their native dtype (bf16 feeds the MXU directly);
    accumulation is f32 via preferred_element_type; biases arrive pre-cast to
    f32 with shape (1, out) so the add broadcasts in-vreg with no extra work.
    """

    def kernel(x_ref, *refs):
        out_ref = refs[-1]
        h = x_ref[...]
        for i in range(num_layers):
            w_ref = refs[2 * i]
            b_ref = refs[2 * i + 1]
            acc = jnp.dot(h, w_ref[...], preferred_element_type=jnp.float32)
            acc = acc + b_ref[...]  # f32 bias, broadcasts over rows
            if i < num_layers - 1:
                # ReLU, then back to the matmul dtype for the next layer.
                h = jnp.maximum(acc, 0.0).astype(w_ref.dtype)
            else:
                out_ref[...] = acc.astype(out_ref.dtype)

    return kernel


def _target_row_tile():
    """Generation-tuned row tile: 128 on v5e (128-wide MXU), 256 on v6e/v7x."""
    try:
        kind = jax.devices()[0].device_kind.lower()
    except Exception:
        return 256
    return 128 if "v5" in kind else 256


def _choose_row_tile(rows, target):
    rt = min(target, _round_up(rows, _SUBLANE))
    # v7x has 2 TensorCores; prefer >= 2 grid steps when there is enough work.
    if rows >= 2 * 128 and _cdiv(rows, rt) < 2:
        rt = _round_up(_cdiv(rows, 2), _SUBLANE)
    return max(rt, _SUBLANE)


def _vmem_estimate(row_tile, dims, x_itemsize, w_itemsize, weight_buffers):
    """Rough per-step VMEM footprint in bytes."""
    wbytes = 0
    for pin, pout in zip(dims[:-1], dims[1:]):
        wbytes += pin * pout * w_itemsize + pout * 4  # weight + f32 bias
    wbytes *= weight_buffers
    act = row_tile * dims[0] * x_itemsize * 2        # input tile, double buf
    out = row_tile * dims[-1] * x_itemsize * 2       # output tile, double buf
    inter = row_tile * max(dims) * 4 * 2             # live f32 intermediates
    return wbytes + act + out + inter


def mlp_forward(x, weights, biases, *, row_tile=None,
                vmem_budget_bytes=48 * 2**20):
    """Apply the MLP to x of shape [..., in_dim].

    weights[i]: [in_i, out_i] (already transposed from PyTorch's [out, in])
    biases[i]:  [out_i]
    """
    num_layers = len(weights)
    lead_shape = x.shape[:-1]
    in_dim = x.shape[-1]
    out_dim = weights[-1].shape[-1]

    # ---- lane-dense feature padding ---------------------------------------
    # Hidden/output dims are zero-padded up to a multiple of 128 so every
    # intermediate and the final store are full-lane (no masked vst).  Zero
    # padding keeps the math exact: padded columns stay identically 0 through
    # bias-add and ReLU, and padded weight rows contribute nothing downstream.
    dims = [in_dim] + [w.shape[1] for w in weights]
    pdims = [in_dim] + [_round_up(d, _LANE) for d in dims[1:]]

    padded_ws, padded_bs = [], []
    for i, (w, b) in enumerate(zip(weights, biases)):
        pin, pout = pdims[i], pdims[i + 1]
        if w.shape != (pin, pout):
            w = jnp.pad(w, ((0, pin - w.shape[0]), (0, pout - w.shape[1])))
        b = b.astype(jnp.float32)
        if b.shape[0] != pout:
            b = jnp.pad(b, (0, pout - b.shape[0]))
        padded_ws.append(w)
        padded_bs.append(b.reshape(1, pout))

    # ---- row tiling ---------------------------------------------------------
    x2d = x.reshape(-1, in_dim)
    rows = x2d.shape[0]
    if row_tile is None:
        row_tile = _target_row_tile()
    row_tile = _choose_row_tile(rows, row_tile)

    # Shrink the row tile until the per-step working set fits the budget
    # (v7x only has 64 MiB of VMEM -> stay well under ~48 MiB).
    x_isz = jnp.dtype(x.dtype).itemsize
    w_isz = jnp.dtype(weights[0].dtype).itemsize
    while (row_tile > _SUBLANE and
           _vmem_estimate(row_tile, pdims, x_isz, w_isz, 1) > vmem_budget_bytes):
        row_tile = max(_SUBLANE, _round_up(row_tile // 2, _SUBLANE))
    # TODO(synk): if the resident-weight footprint still exceeds the budget
    # (very wide layers), switch to a K/N-tiled grid with a VMEM f32
    # accumulator + pl.when init/finalize instead of fully-resident weights.

    padded_rows = _round_up(rows, row_tile)
    if padded_rows != rows:
        x2d = jnp.pad(x2d, ((0, padded_rows - rows), (0, 0)))
    grid = (padded_rows // row_tile,)

    est = _vmem_estimate(row_tile, pdims, x_isz, w_isz, 2)
    vmem_limit = int(min(max(2 * est, 32 * 2**20), 56 * 2**20))

    kernel = _make_mlp_kernel(num_layers)
    call_args = [x2d]
    for w, b in zip(padded_ws, padded_bs):
        call_args.append(w)
        call_args.append(b)

    def run(single_buffer_weights):
        wmode = {}
        if single_buffer_weights and hasattr(pl, "Buffered"):
            # Constant block index -> weights/biases are DMA'd once; a single
            # buffer halves their VMEM footprint at zero DMA cost.
            wmode = dict(pipeline_mode=pl.Buffered(1))
        in_specs = [pl.BlockSpec((row_tile, in_dim), lambda i: (i, 0))]
        for w, b in zip(padded_ws, padded_bs):
            in_specs.append(pl.BlockSpec(w.shape, lambda i: (0, 0), **wmode))
            in_specs.append(pl.BlockSpec(b.shape, lambda i: (0, 0), **wmode))
        out_spec = pl.BlockSpec((row_tile, pdims[-1]), lambda i: (i, 0))
        return pl.pallas_call(
            kernel,
            grid=grid,
            in_specs=in_specs,
            out_specs=out_spec,
            out_shape=jax.ShapeDtypeStruct((padded_rows, pdims[-1]), x.dtype),
            compiler_params=pltpu.CompilerParams(
                dimension_semantics=("parallel",),
                vmem_limit_bytes=vmem_limit,
            ),
        )(*call_args)

    try:
        y2d = run(True)
    except Exception:
        # pipeline_mode/Buffered not supported by this jax version: fall back
        # to default double-buffered weight specs.
        y2d = run(False)

    y2d = y2d[:rows, :out_dim]
    return y2d.reshape(*lead_shape, out_dim)


def init_mlp_params(key, in_dim, out_dim, hidden_list, dtype=jnp.float32):
    """Deterministic init mimicking nn.Linear (uniform +/- 1/sqrt(fan_in))."""
    dims = [in_dim] + list(hidden_list) + [out_dim]
    weights, biases = [], []
    for i in range(len(dims) - 1):
        fan_in, fan_out = dims[i], dims[i + 1]
        key, kw, kb = jax.random.split(key, 3)
        bound = 1.0 / jnp.sqrt(jnp.asarray(fan_in, dtype))
        # stored as [in, out] (transposed relative to PyTorch's [out, in])
        w = jax.random.uniform(kw, (fan_in, fan_out), dtype,
                               minval=-bound, maxval=bound)
        b = jax.random.uniform(kb, (fan_out,), dtype,
                               minval=-bound, maxval=bound)
        weights.append(w)
        biases.append(b)
    return weights, biases


def mlp_reference(x, weights, biases):
    """Plain-JAX reference of the same forward pass."""
    h = x.reshape(-1, x.shape[-1]).astype(jnp.float32)
    for i, (w, b) in enumerate(zip(weights, biases)):
        h = h @ w.astype(jnp.float32) + b.astype(jnp.float32)
        if i < len(weights) - 1:
            h = jnp.maximum(h, 0.0)
    return h.reshape(*x.shape[:-1], -1).astype(x.dtype)


if __name__ == "__main__":
    key = jax.random.PRNGKey(0)

    in_dim, out_dim, hidden_list = 32, 16, [64, 64]
    k_x, k_x2, k_p = jax.random.split(key, 3)

    weights, biases = init_mlp_params(k_p, in_dim, out_dim, hidden_list)

    # Small shape consistent with the module: x = [batch=2, seq=8, in_dim=32].
    x = jax.random.normal(k_x, (2, 8, in_dim), dtype=jnp.float32)
    y = jax.block_until_ready(mlp_forward(x, weights, biases))
    y_ref = mlp_reference(x, weights, biases)
    assert y.shape == (2, 8, out_dim), y.shape
    assert jnp.allclose(y, y_ref, atol=1e-4, rtol=1e-4), \
        float(jnp.max(jnp.abs(y - y_ref)))

    # Second check: enough rows to exercise a multi-step grid + row padding.
    x2 = jax.random.normal(k_x2, (4, 100, in_dim), dtype=jnp.float32)
    y2 = jax.block_until_ready(mlp_forward(x2, weights, biases))
    y2_ref = mlp_reference(x2, weights, biases)
    assert y2.shape == (4, 100, out_dim), y2.shape
    assert jnp.allclose(y2, y2_ref, atol=1e-4, rtol=1e-4), \
        float(jnp.max(jnp.abs(y2 - y2_ref)))

    print("KERNEL_OK")
</pallas_src>

<mosaic_0001>
module attributes {stable_mosaic.version = 11 : i64} {
  func.func @kernel(%arg0: i32, %arg1: memref<16x32xf32, #tpu.memory_space<vmem>>, %arg2: memref<32x128xf32, #tpu.memory_space<vmem>>, %arg3: memref<1x128xf32, #tpu.memory_space<vmem>>, %arg4: memref<128x128xf32, #tpu.memory_space<vmem>>, %arg5: memref<1x128xf32, #tpu.memory_space<vmem>>, %arg6: memref<128x128xf32, #tpu.memory_space<vmem>>, %arg7: memref<1x128xf32, #tpu.memory_space<vmem>>, %arg8: memref<16x128xf32, #tpu.memory_space<vmem>>) attributes {dimension_semantics = [#tpu.dimension_semantics<parallel>], iteration_bounds = array<i64: 1>, scalar_prefetch = 0 : i64, scratch_operands = 0 : i64, tpu.core_type = #tpu.core_type<tc>, window_params = [{transform_indices = @transform_0, window_bounds = array<i64: 16, 32>}, {pipeline_mode = #tpu.pipeline_mode<synchronous>, transform_indices = @transform_1, window_bounds = array<i64: 32, 128>}, {pipeline_mode = #tpu.pipeline_mode<synchronous>, transform_indices = @transform_2, window_bounds = array<i64: 1, 128>}, {pipeline_mode = #tpu.pipeline_mode<synchronous>, transform_indices = @transform_3, window_bounds = array<i64: 128, 128>}, {pipeline_mode = #tpu.pipeline_mode<synchronous>, transform_indices = @transform_4, window_bounds = array<i64: 1, 128>}, {pipeline_mode = #tpu.pipeline_mode<synchronous>, transform_indices = @transform_5, window_bounds = array<i64: 128, 128>}, {pipeline_mode = #tpu.pipeline_mode<synchronous>, transform_indices = @transform_6, window_bounds = array<i64: 1, 128>}, {transform_indices = @transform_7, window_bounds = array<i64: 16, 128>}]} {
    %c0 = arith.constant 0 : index
    %c0_0 = arith.constant 0 : index
    %0 = vector.load %arg1[%c0, %c0_0] : memref<16x32xf32, #tpu.memory_space<vmem>>, vector<16x32xf32>
    %c0_1 = arith.constant 0 : index
    %c0_2 = arith.constant 0 : index
    %1 = vector.load %arg2[%c0_1, %c0_2] : memref<32x128xf32, #tpu.memory_space<vmem>>, vector<32x128xf32>
    %cst = arith.constant dense<0.000000e+00> : vector<16x128xf32>
    %2 = tpu.matmul %0, %1, %cst {dimension_numbers = #tpu.dot_dimension_numbers<[1], [0], [0], [1], [0, 0, 1, 1], [], []>} : vector<16x32xf32>, vector<32x128xf32>, vector<16x128xf32> -> vector<16x128xf32>
    %c0_3 = arith.constant 0 : index
    %c0_4 = arith.constant 0 : index
    %3 = vector.load %arg3[%c0_3, %c0_4] : memref<1x128xf32, #tpu.memory_space<vmem>>, vector<1x128xf32>
    %4 = vector.broadcast %3 : vector<1x128xf32> to vector<16x128xf32>
    %5 = arith.addf %2, %4 : vector<16x128xf32>
    %cst_5 = arith.constant 0.000000e+00 : f32
    %6 = vector.broadcast %cst_5 : f32 to vector<16x128xf32>
    %7 = arith.maximumf %5, %6 : vector<16x128xf32>
    %c0_6 = arith.constant 0 : index
    %c0_7 = arith.constant 0 : index
    %8 = vector.load %arg4[%c0_6, %c0_7] : memref<128x128xf32, #tpu.memory_space<vmem>>, vector<128x128xf32>
    %cst_8 = arith.constant dense<0.000000e+00> : vector<16x128xf32>
    %9 = tpu.matmul %7, %8, %cst_8 {dimension_numbers = #tpu.dot_dimension_numbers<[1], [0], [0], [1], [0, 0, 1, 1], [], []>} : vector<16x128xf32>, vector<128x128xf32>, vector<16x128xf32> -> vector<16x128xf32>
    %c0_9 = arith.constant 0 : index
    %c0_10 = arith.constant 0 : index
    %10 = vector.load %arg5[%c0_9, %c0_10] : memref<1x128xf32, #tpu.memory_space<vmem>>, vector<1x128xf32>
    %11 = vector.broadcast %10 : vector<1x128xf32> to vector<16x128xf32>
    %12 = arith.addf %9, %11 : vector<16x128xf32>
    %cst_11 = arith.constant 0.000000e+00 : f32
    %13 = vector.broadcast %cst_11 : f32 to vector<16x128xf32>
    %14 = arith.maximumf %12, %13 : vector<16x128xf32>
    %c0_12 = arith.constant 0 : index
    %c0_13 = arith.constant 0 : index
    %15 = vector.load %arg6[%c0_12, %c0_13] : memref<128x128xf32, #tpu.memory_space<vmem>>, vector<128x128xf32>
    %cst_14 = arith.constant dense<0.000000e+00> : vector<16x128xf32>
    %16 = tpu.matmul %14, %15, %cst_14 {dimension_numbers = #tpu.dot_dimension_numbers<[1], [0], [0], [1], [0, 0, 1, 1], [], []>} : vector<16x128xf32>, vector<128x128xf32>, vector<16x128xf32> -> vector<16x128xf32>
    %c0_15 = arith.constant 0 : index
    %c0_16 = arith.constant 0 : index
    %17 = vector.load %arg7[%c0_15, %c0_16] : memref<1x128xf32, #tpu.memory_space<vmem>>, vector<1x128xf32>
    %18 = vector.broadcast %17 : vector<1x128xf32> to vector<16x128xf32>
    %19 = arith.addf %16, %18 : vector<16x128xf32>
    %c0_17 = arith.constant 0 : index
    %c0_18 = arith.constant 0 : index
    %20 = vector.load %arg8[%c0_17, %c0_18] : memref<16x128xf32, #tpu.memory_space<vmem>>, vector<16x128xf32>
    tpu.vector_store %arg8[%c0_17, %c0_18], %19 {strides = array<i32>} : memref<16x128xf32, #tpu.memory_space<vmem>>, vector<16x128xf32>,
    return
  }
  func.func @transform_0(%arg0: i32) -> (i32, i32) {
    %c0_i32 = arith.constant 0 : i32
    %c0_i32_0 = arith.constant 0 : i32
    return %arg0, %c0_i32 : i32, i32
  }
  func.func @transform_1(%arg0: i32) -> (i32, i32) {
    %c0_i32 = arith.constant 0 : i32
    %c0_i32_0 = arith.constant 0 : i32
    %c0_i32_1 = arith.constant 0 : i32
    return %c0_i32, %c0_i32_0 : i32, i32
  }
  func.func @transform_2(%arg0: i32) -> (i32, i32) {
    %c0_i32 = arith.constant 0 : i32
    %c0_i32_0 = arith.constant 0 : i32
    %c0_i32_1 = arith.constant 0 : i32
    return %c0_i32, %c0_i32_0 : i32, i32
  }
  func.func @transform_3(%arg0: i32) -> (i32, i32) {
    %c0_i32 = arith.constant 0 : i32
    %c0_i32_0 = arith.constant 0 : i32
    %c0_i32_1 = arith.constant 0 : i32
    return %c0_i32, %c0_i32_0 : i32, i32
  }
  func.func @transform_4(%arg0: i32) -> (i32, i32) {
    %c0_i32 = arith.constant 0 : i32
    %c0_i32_0 = arith.constant 0 : i32
    %c0_i32_1 = arith.constant 0 : i32
    return %c0_i32, %c0_i32_0 : i32, i32
  }
  func.func @transform_5(%arg0: i32) -> (i32, i32) {
    %c0_i32 = arith.constant 0 : i32
    %c0_i32_0 = arith.constant 0 : i32
    %c0_i32_1 = arith.constant 0 : i32
    return %c0_i32, %c0_i32_0 : i32, i32
  }
  func.func @transform_6(%arg0: i32) -> (i32, i32) {
    %c0_i32 = arith.constant 0 : i32
    %c0_i32_0 = arith.constant 0 : i32
    %c0_i32_1 = arith.constant 0 : i32
    return %c0_i32, %c0_i32_0 : i32, i32
  }
  func.func @transform_7(%arg0: i32) -> (i32, i32) {
    %c0_i32 = arith.constant 0 : i32
    %c0_i32_0 = arith.constant 0 : i32
    return %arg0, %c0_i32 : i32, i32
  }
}

module attributes {stable_mosaic.version = 11 : i64} {
  func.func @kernel(%arg0: i32, %arg1: memref<16x32xf32, #tpu.memory_space<vmem>>, %arg2: memref<32x128xf32, #tpu.memory_space<vmem>>, %arg3: memref<1x128xf32, #tpu.memory_space<vmem>>, %arg4: memref<128x128xf32, #tpu.memory_space<vmem>>, %arg5: memref<1x128xf32, #tpu.memory_space<vmem>>, %arg6: memref<128x128xf32, #tpu.memory_space<vmem>>, %arg7: memref<1x128xf32, #tpu.memory_space<vmem>>, %arg8: memref<16x128xf32, #tpu.memory_space<vmem>>) attributes {dimension_semantics = [#tpu.dimension_semantics<parallel>], iteration_bounds = array<i64: 1>, scalar_prefetch = 0 : i64, scratch_operands = 0 : i64, tpu.core_type = #tpu.core_type<tc>, window_params = [{transform_indices = @transform_0, window_bounds = array<i64: 16, 32>}, {pipeline_mode = #tpu.pipeline_mode<synchronous>, transform_indices = @transform_1, window_bounds = array<i64: 32, 128>}, {pipeline_mode = #tpu.pipeline_mode<synchronous>, transform_indices = @transform_2, window_bounds = array<i64: 1, 128>}, {pipeline_mode = #tpu.pipeline_mode<synchronous>, transform_indices = @transform_3, window_bounds = array<i64: 128, 128>}, {pipeline_mode = #tpu.pipeline_mode<synchronous>, transform_indices = @transform_4, window_bounds = array<i64: 1, 128>}, {pipeline_mode = #tpu.pipeline_mode<synchronous>, transform_indices = @transform_5, window_bounds = array<i64: 128, 128>}, {pipeline_mode = #tpu.pipeline_mode<synchronous>, transform_indices = @transform_6, window_bounds = array<i64: 1, 128>}, {transform_indices = @transform_7, window_bounds = array<i64: 16, 128>}]} {
    %c0 = arith.constant 0 : index
    %c0_0 = arith.constant 0 : index
    %0 = vector.load %arg1[%c0, %c0_0] : memref<16x32xf32, #tpu.memory_space<vmem>>, vector<16x32xf32>
    %c0_1 = arith.constant 0 : index
    %c0_2 = arith.constant 0 : index
    %1 = vector.load %arg2[%c0_1, %c0_2] : memref<32x128xf32, #tpu.memory_space<vmem>>, vector<32x128xf32>
    %cst = arith.constant dense<0.000000e+00> : vector<16x128xf32>
    %2 = tpu.matmul %0, %1, %cst {dimension_numbers = #tpu.dot_dimension_numbers<[1], [0], [0], [1], [0, 0, 1, 1], [], []>} : vector<16x32xf32>, vector<32x128xf32>, vector<16x128xf32> -> vector<16x128xf32>
    %c0_3 = arith.constant 0 : index
    %c0_4 = arith.constant 0 : index
    %3 = vector.load %arg3[%c0_3, %c0_4] : memref<1x128xf32, #tpu.memory_space<vmem>>, vector<1x128xf32>
    %4 = vector.broadcast %3 : vector<1x128xf32> to vector<16x128xf32>
    %5 = arith.addf %2, %4 : vector<16x128xf32>
    %cst_5 = arith.constant 0.000000e+00 : f32
    %6 = vector.broadcast %cst_5 : f32 to vector<16x128xf32>
    %7 = arith.maximumf %5, %6 : vector<16x128xf32>
    %c0_6 = arith.constant 0 : index
    %c0_7 = arith.constant 0 : index
    %8 = vector.load %arg4[%c0_6, %c0_7] : memref<128x128xf32, #tpu.memory_space<vmem>>, vector<128x128xf32>
    %cst_8 = arith.constant dense<0.000000e+00> : vector<16x128xf32>
    %9 = tpu.matmul %7, %8, %cst_8 {dimension_numbers = #tpu.dot_dimension_numbers<[1], [0], [0], [1], [0, 0, 1, 1], [], []>} : vector<16x128xf32>, vector<128x128xf32>, vector<16x128xf32> -> vector<16x128xf32>
    %c0_9 = arith.constant 0 : index
    %c0_10 = arith.constant 0 : index
    %10 = vector.load %arg5[%c0_9, %c0_10] : memref<1x128xf32, #tpu.memory_space<vmem>>, vector<1x128xf32>
    %11 = vector.broadcast %10 : vector<1x128xf32> to vector<16x128xf32>
    %12 = arith.addf %9, %11 : vector<16x128xf32>
    %cst_11 = arith.constant 0.000000e+00 : f32
    %13 = vector.broadcast %cst_11 : f32 to vector<16x128xf32>
    %14 = arith.maximumf %12, %13 : vector<16x128xf32>
    %c0_12 = arith.constant 0 : index
    %c0_13 = arith.constant 0 : index
    %15 = vector.load %arg6[%c0_12, %c0_13] : memref<128x128xf32, #tpu.memory_space<vmem>>, vector<128x128xf32>
    %cst_14 = arith.constant dense<0.000000e+00> : vector<16x128xf32>
    %16 = tpu.matmul %14, %15, %cst_14 {dimension_numbers = #tpu.dot_dimension_numbers<[1], [0], [0], [1], [0, 0, 1, 1], [], []>} : vector<16x128xf32>, vector<128x128xf32>, vector<16x128xf32> -> vector<16x128xf32>
    %c0_15 = arith.constant 0 : index
    %c0_16 = arith.constant 0 : index
    %17 = vector.load %arg7[%c0_15, %c0_16] : memref<1x128xf32, #tpu.memory_space<vmem>>, vector<1x128xf32>
    %18 = vector.broadcast %17 : vector<1x128xf32> to vector<16x128xf32>
    %19 = arith.addf %16, %18 : vector<16x128xf32>
    %c0_17 = arith.constant 0 : index
    %c0_18 = arith.constant 0 : index
    %20 = vector.load %arg8[%c0_17, %c0_18] : memref<16x128xf32, #tpu.memory_space<vmem>>, vector<16x128xf32>
    tpu.vector_store %arg8[%c0_17, %c0_18], %19 {strides = array<i32>} : memref<16x128xf32, #tpu.memory_space<vmem>>, vector<16x128xf32>,
    return
  }
  func.func @transform_0(%arg0: i32) -> (i32, i32) {
    %c0_i32 = arith.constant 0 : i32
    %c0_i32_0 = arith.constant 0 : i32
    return %arg0, %c0_i32 : i32, i32
  }
  func.func @transform_1(%arg0: i32) -> (i32, i32) {
    %c0_i32 = arith.constant 0 : i32
    %c0_i32_0 = arith.constant 0 : i32
    %c0_i32_1 = arith.constant 0 : i32
    return %c0_i32, %c0_i32_0 : i32, i32
  }
  func.func @transform_2(%arg0: i32) -> (i32, i32) {
    %c0_i32 = arith.constant 0 : i32
    %c0_i32_0 = arith.constant 0 : i32
    %c0_i32_1 = arith.constant 0 : i32
    return %c0_i32, %c0_i32_0 : i32, i32
  }
  func.func @transform_3(%arg0: i32) -> (i32, i32) {
    %c0_i32 = arith.constant 0 : i32
    %c0_i32_0 = arith.constant 0 : i32
    %c0_i32_1 = arith.constant 0 : i32
    return %c0_i32, %c0_i32_0 : i32, i32
  }
  func.func @transform_4(%arg0: i32) -> (i32, i32) {
    %c0_i32 = arith.constant 0 : i32
    %c0_i32_0 = arith.constant 0 : i32
    %c0_i32_1 = arith.constant 0 : i32
    return %c0_i32, %c0_i32_0 : i32, i32
  }
  func.func @transform_5(%arg0: i32) -> (i32, i32) {
    %c0_i32 = arith.constant 0 : i32
    %c0_i32_0 = arith.constant 0 : i32
    %c0_i32_1 = arith.constant 0 : i32
    return %c0_i32, %c0_i32_0 : i32, i32
  }
  func.func @transform_6(%arg0: i32) -> (i32, i32) {
    %c0_i32 = arith.constant 0 : i32
    %c0_i32_0 = arith.constant 0 : i32
    %c0_i32_1 = arith.constant 0 : i32
    return %c0_i32, %c0_i32_0 : i32, i32
  }
  func.func @transform_7(%arg0: i32) -> (i32, i32) {
    %c0_i32 = arith.constant 0 : i32
    %c0_i32_0 = arith.constant 0 : i32
    return %arg0, %c0_i32 : i32, i32
  }
}

</mosaic_0001>

<bundles_post_ra>
// kernel: tpu_custom_call.1
= control target key start
LH: loop header
LB: loop body
LE: loop exit
PB: predicated region body
PF: predicated region fallthrough
CT: control target
= control target key end

     0   :  { %12 = vsyncpa [#allocation3], 0  ;;  %s487_s0 = inlined_call_operand.hbm [shape: f32[16,32], index: 0, kind: input, shape index: {}]   ;;  %s488_s1 = inlined_call_operand.hbm [shape: f32[32,128], index: 1, kind: input, shape index: {}]   ;;  %s489_s2 = inlined_call_operand.vmem [shape: f32[1,128], index: 2, kind: input, shape index: {}]   ;;  %s490_s3 = inlined_call_operand.hbm [shape: f32[128,128], index: 3, kind: input, shape index: {}]   ;;  %s491_s4 = inlined_call_operand.vmem [shape: f32[1,128], index: 4, kind: input, shape index: {}]   ;;  %s492_s5 = inlined_call_operand.hbm [shape: f32[128,128], index: 5, kind: input, shape index: {}]   ;;  %s493_s6 = inlined_call_operand.vmem [shape: f32[1,128], index: 6, kind: input, shape index: {}]   ;;  %s494_s7 = inlined_call_operand.hbm [shape: f32[16,128], index: 7, kind: output, shape index: {}]  }
   0x1   :  { %13 = vsyncpa [#allocation6], 0 }
   0x2   :  { %14 = vsyncpa [#allocation9], 0 }
   0x3   :  { %15 = vsyncpa [#allocation4], 0  ;;  %s33_s26 = sshll.u32 %s488_s1, 4  ;;  %s399_s27 = smov [#allocation5]   ;;  %s34_s26 = int_to_ptr.hbm [resolvable:$true] %s33_s26 }
   0x4   :  { %s35_s28 = sshll.u32 %s399_s27, 4  ;;  %s20_s8 = sshll.u32 %s487_s0, 4  ;;  %s36_s28 = int_to_ptr.vmem [resolvable:$true] %s35_s28  ;;  %s21_s8 = int_to_ptr.hbm [resolvable:$true] %s20_s8 }
   0x5   :  { %s400_s9 = smov 128   ;;  %s401_s10 = smov 8  }
   0x6   :  { %41 = dma.hbm_to_vmem [thread:$0]  %s34_s26, 512, %s36_s28, [#allocation6], %s400_s9, %s400_s9, %s401_s10  }
   0x7   :  { %s402_s11 = smov [#allocation2]   ;;  %s48_s1 = sshll.u32 %s490_s3, 4  ;;  %s49_s1 = int_to_ptr.hbm [resolvable:$true] %s48_s1 }
   0x8   :  { %s22_s12 = sshll.u32 %s402_s11, 4  ;;  %s63_s16 = sshll.u32 %s492_s5, 4  ;;  %s23_s12 = int_to_ptr.vmem [resolvable:$true] %s22_s12  ;;  %s64_s16 = int_to_ptr.hbm [resolvable:$true] %s63_s16 }
   0x9   :  { %28 = dma.hbm_to_vmem [thread:$0]  %s21_s8, 256, %s23_s12, [#allocation3], %s400_s9, %s400_s9, %s401_s10  }
   0xa   :  { %s403_s17 = smov [#allocation7]   ;;  %s404_s19 = smov [#allocation8]  }
   0xb   :  { %s50_s18 = sshll.u32 %s403_s17, 4  ;;  %s65_s3 = sshll.u32 %s404_s19, 4  ;;  %s51_s18 = int_to_ptr.vmem [resolvable:$true] %s50_s18  ;;  %s66_s3 = int_to_ptr.vmem [resolvable:$true] %s65_s3 }
   0xc   :  { %56 = dma.hbm_to_vmem [thread:$0]  %s49_s1, 2048, %s51_s18, [#allocation6], %s400_s9, %s400_s9, %s401_s10  }
   0xd   :  { %71 = dma.hbm_to_vmem [thread:$0]  %s64_s16, 2048, %s66_s3, [#allocation9], %s400_s9, %s400_s9, %s401_s10  }
   0xe   :  { %391 = dma.done.wait [#allocation3], 256  }
   0xf   :  { %392 = vsyncadd [#allocation3], 4294967040 }
  0x10   :  { %393 = dma.done.wait [#allocation6], 2560  }
  0x11   :  { %394 = vsyncadd [#allocation6], 4294964736 }
  0x12   :  { %395 = dma.done.wait [#allocation9], 2048  }
  0x13   :  { %396 = vsyncadd [#allocation9], 4294965248  ;;  %v95_v0 = vld [vmem:[#allocation5 + $0x18] sm:$0xff]  ;;  %v94_v1 = vld [vmem:[#allocation5 + $0x10] sm:$0xff]  ;;  %vm100_vm0 = vcmask 261120   ;;  %s405_s24 = smov [#allocation10]  }
  0x14   :  { %119 = vmatpush.msra.mxu0 %v95_v0  ;;  %v93_v2 = vld [vmem:[#allocation5 + $0x8] sm:$0xff]  ;;  %v147_v3 = vld [vmem:[#allocation7 + $0x78] sm:$0xff]  ;;  %v146_v4 = vld [vmem:[#allocation7 + $0x70] sm:$0xff]  ;;  %s226_s25 = sshll.u32 %s405_s24, 4  ;;  %s227_s25 = int_to_ptr.vmem [resolvable:$true] %s226_s25 }
  0x15   :  { %152 = vmatpush.msra.mxu1 %v147_v3  ;;  %v92_v5 = vld [vmem:[#allocation5] sm:$0xff]  ;;  %v145_v6 = vld [vmem:[#allocation7 + $0x68] sm:$0xff]  ;;  %245 = vmatpush.msra.mxu3 %v147_v3  ;;  %v90_v7 = vld [vmem:[#allocation2] sm:$0xff] }
  0x16   :  { %120 = vmatpush.msra.mxu0 %v94_v1  ;;  %v144_v8 = vld [vmem:[#allocation7 + $0x60] sm:$0xff]  ;;  %v143_v9 = vld [vmem:[#allocation7 + $0x58] sm:$0xff]  ;;  %v142_v10 = vld [vmem:[#allocation7 + $0x50] sm:$0xff] }
  0x17   :  { %153 = vmatpush.msra.mxu1 %v146_v4  ;;  %246 = vmatpush.msra.mxu3 %v146_v4  ;;  %v141_v11 = vld [vmem:[#allocation7 + $0x48] sm:$0xff]  ;;  %v91_v12 = vld [vmem:[#allocation2 + $0x8] sm:$0xff]  ;;  %v140_v13 = vld [vmem:[#allocation7 + $0x40] sm:$0xff] }
  0x18   :  { %121 = vmatpush.msra.mxu0 %v93_v2  ;;  %v139_v14 = vld [vmem:[#allocation7 + $0x38] sm:$0xff]  ;;  %v138_v15 = vld [vmem:[#allocation7 + $0x30] sm:$0xff]  ;;  %v137_v16 = vld [vmem:[#allocation7 + $0x28] sm:$0xff] }
  0x19   :  { %154 = vmatpush.msra.mxu1 %v145_v6  ;;  %247 = vmatpush.msra.mxu3 %v145_v6  ;;  %v136_v17 = vld [vmem:[#allocation7 + $0x20] sm:$0xff]  ;;  %v135_v18 = vld [vmem:[#allocation7 + $0x18] sm:$0xff]  ;;  %v134_v19 = vld [vmem:[#allocation7 + $0x10] sm:$0xff] }
  0x1a   :  { %122 = vmatpush.msra.mxu0 %v92_v5  ;;  %v133_v20 = vld [vmem:[#allocation7 + $0x8] sm:$0xff]  ;;  %v132_v21 = vld [vmem:[#allocation7] sm:$0xff]  ;;  %v192_v22 = vld [vmem:[#allocation8 + $0x78] sm:$0xff] }
  0x1b   :  { %243 = vmatmul.msk.f32.vlgmr.msra.gmra.mxu0 %vm100_vm0, %v90_v7  ;;  %155 = vmatpush.msra.mxu1 %v144_v8  ;;  %v191_v23 = vld [vmem:[#allocation8 + $0x70] sm:$0xff]  ;;  %v190_v24 = vld [vmem:[#allocation8 + $0x68] sm:$0xff]  ;;  %v189_v25 = vld [vmem:[#allocation8 + $0x60] sm:$0xff] }
  0x1c   :  { %248 = vmatpush.msra.mxu3 %v144_v8  ;;  %197 = vmatpush.msra.mxu2 %v192_v22  ;;  %v188_v26 = vld [vmem:[#allocation8 + $0x58] sm:$0xff]  ;;  %v187_v27 = vld [vmem:[#allocation8 + $0x50] sm:$0xff]  ;;  %v186_v28 = vld [vmem:[#allocation8 + $0x48] sm:$0xff] }
  0x1d   :  { %156 = vmatpush.msra.mxu1 %v143_v9  ;;  %v185_v29 = vld [vmem:[#allocation8 + $0x40] sm:$0xff]  ;;  %v184_v30 = vld [vmem:[#allocation8 + $0x38] sm:$0xff]  ;;  %v268_v31 = vld [vmem:[%s489_s2] ss:$0 sm:$0xff] }
  0x1e   :  { %249 = vmatpush.msra.mxu3 %v143_v9  ;;  %198 = vmatpush.msra.mxu2 %v191_v23  ;;  %v183_v32 = vld [vmem:[#allocation8 + $0x30] sm:$0xff]  ;;  %v182_v33 = vld [vmem:[#allocation8 + $0x28] sm:$0xff]  ;;  %v181_v36 = vld [vmem:[#allocation8 + $0x20] sm:$0xff] }
  0x1f   :  { %157 = vmatpush.msra.mxu1 %v142_v10  ;;  %v180_v38 = vld [vmem:[#allocation8 + $0x18] sm:$0xff]  ;;  %v179_v42 = vld [vmem:[#allocation8 + $0x10] sm:$0xff]  ;;  %v178_v43 = vld [vmem:[#allocation8 + $0x8] sm:$0xff] }
  0x20   :  { %250 = vmatpush.msra.mxu3 %v142_v10  ;;  %199 = vmatpush.msra.mxu2 %v190_v24  ;;  %v177_v44 = vld [vmem:[#allocation8] sm:$0xff]  ;;  %v269_v45 = vld [vmem:[%s491_s4] ss:$0 sm:$0xff]  ;;  %s228_s4 = sshll.u32 %s494_s7, 4  ;;  %s229_s4 = int_to_ptr.hbm [resolvable:$true] %s228_s4 }
  0x21   :  { %158 = vmatpush.msra.mxu1 %v141_v11  ;;  %v270_v52 = vld [vmem:[%s493_s6] ss:$0 sm:$0xff] }
  0x22   :  { %251 = vmatpush.msra.mxu3 %v141_v11  ;;  %200 = vmatpush.msra.mxu2 %v189_v25 }
  0x23   :  { %244 = vmatmul.msk.f32.gmra.mxu0 %vm100_vm0, %v91_v12  ;;  %159 = vmatpush.msra.mxu1 %v140_v13 }
  0x24   :  { %252 = vmatpush.msra.mxu3 %v140_v13  ;;  %201 = vmatpush.msra.mxu2 %v188_v26 }
  0x25   :  { %160 = vmatpush.msra.mxu1 %v139_v14 }
  0x26   :  { %253 = vmatpush.msra.mxu3 %v139_v14  ;;  %202 = vmatpush.msra.mxu2 %v187_v27 }
  0x27   :  { %161 = vmatpush.msra.mxu1 %v138_v15 }
  0x28   :  { %254 = vmatpush.msra.mxu3 %v138_v15  ;;  %203 = vmatpush.msra.mxu2 %v186_v28 }
  0x29   :  { %162 = vmatpush.msra.mxu1 %v137_v16 }
  0x2a   :  { %255 = vmatpush.msra.mxu3 %v137_v16  ;;  %204 = vmatpush.msra.mxu2 %v185_v29 }
  0x2b   :  { %163 = vmatpush.msra.mxu1 %v136_v17 }
  0x2c   :  { %256 = vmatpush.msra.mxu3 %v136_v17  ;;  %205 = vmatpush.msra.mxu2 %v184_v30 }
  0x2d   :  { %164 = vmatpush.msra.mxu1 %v135_v18 }
  0x2e   :  { %257 = vmatpush.msra.mxu3 %v135_v18  ;;  %206 = vmatpush.msra.mxu2 %v183_v32 }
  0x2f   :  { %165 = vmatpush.msra.mxu1 %v134_v19 }
  0x30   :  { %258 = vmatpush.msra.mxu3 %v134_v19  ;;  %207 = vmatpush.msra.mxu2 %v182_v33 }
  0x31   :  { %166 = vmatpush.msra.mxu1 %v133_v20 }
  0x32   :  { %259 = vmatpush.msra.mxu3 %v133_v20  ;;  %208 = vmatpush.msra.mxu2 %v181_v36 }
  0x33   :  { %167 = vmatpush.msra.mxu1 %v132_v21 }
  0x34   :  { %260 = vmatpush.msra.mxu3 %v132_v21  ;;  %209 = vmatpush.msra.mxu2 %v180_v38 }
  0x36   :  { %210 = vmatpush.msra.mxu2 %v179_v42 }
  0x38   :  { %211 = vmatpush.msra.mxu2 %v178_v43 }
  0x3a   :  { %212 = vmatpush.msra.mxu2 %v177_v44 }
  0x98   :  { %v124_v34 = vpop.f32.mrf.mxu0 }
  0x99   :  { %v125_v35 = vadd.f32 %v268_v31, %v124_v34 }
  0x9b   :  { %v130_v37 = vmax.f32 %v125_v35, 0.0 }
  0x9d   :  { %168 = vmatmul.f32.vlgmr.msra.gmra.mxu1 %v130_v37 }
  0xa0   :  { %v127_v39 = vpop.f32.mrf.mxu0 }
  0xa1   :  { %v128_v40 = vadd.f32 %v268_v31, %v127_v39 }
  0xa3   :  { %v131_v41 = vmax.f32 %v128_v40, 0.0 }
  0xa5   :  { %171 = vmatmul.f32.vlgmr.msra.gmra.mxu3 %v131_v41 }
 0x11a   :  { %v169_v46 = vpop.f32.mrf.mxu1 }
 0x11b   :  { %v170_v47 = vadd.f32 %v269_v45, %v169_v46 }
 0x11d   :  { %v175_v48 = vmax.f32 %v170_v47, 0.0 }
 0x11f   :  { %213 = vmatmul.f32.vlgmr.msra.gmra.mxu2 %v175_v48 }
 0x128   :  { %v172_v49 = vpop.f32.mrf.mxu3 }
 0x129   :  { %v173_v50 = vadd.f32 %v269_v45, %v172_v49 }
 0x12b   :  { %v176_v51 = vmax.f32 %v173_v50, 0.0 }
 0x12d   :  { %216 = vmatmul.f32.gmra.mxu2 %v176_v51 }
 0x1a2   :  { %v214_v53 = vpop.f32.mrf.mxu2 }
 0x1a3   :  { %v215_v54 = vadd.f32 %v270_v52, %v214_v53 }
 0x1a5   :  { %220 = vst [vmem:[#allocation10] sm:$0xff] %v215_v54 }
 0x1b0   :  { %v217_v55 = vpop.f32.mrf.mxu2 }
 0x1b1   :  { %v218_v56 = vadd.f32 %v270_v52, %v217_v55 }
 0x1b3   :  { %221 = vst [vmem:[#allocation10 + $0x8] sm:$0xff] %v218_v56 }
 0x1b4   :  { %234 = dma.vmem_to_hbm [thread:$0]  %s227_s25, 256, %s229_s4, [#allocation4], %s400_s9, %s400_s9, %s401_s10  }
 0x1b5   :  { %397 = dma.done.wait [#allocation4], 256  }
 0x1b6   :  { %398 = vsyncadd [#allocation4], 4294967040 }
 0x1b7   :  { %239 = vsyncpa [#allocation3], 1 }
 0x1b8   :  { %240 = vsyncpa [#allocation6], 1 }
 0x1b9   :  { %241 = vsyncpa [#allocation9], 1 }
 0x1ba   :  { %242 = vsyncpa [#allocation4], 1 }

// kernel: tpu_custom_call.1
= control target key start
LH: loop header
LB: loop body
LE: loop exit
PB: predicated region body
PF: predicated region fallthrough
CT: control target
= control target key end

     0   :  { %12 = vsyncpa [#allocation3], 0  ;;  %s487_s0 = inlined_call_operand.hbm [shape: f32[16,32], index: 0, kind: input, shape index: {}]   ;;  %s488_s1 = inlined_call_operand.hbm [shape: f32[32,128], index: 1, kind: input, shape index: {}]   ;;  %s489_s2 = inlined_call_operand.vmem [shape: f32[1,128], index: 2, kind: input, shape index: {}]   ;;  %s490_s3 = inlined_call_operand.hbm [shape: f32[128,128], index: 3, kind: input, shape index: {}]   ;;  %s491_s4 = inlined_call_operand.vmem [shape: f32[1,128], index: 4, kind: input, shape index: {}]   ;;  %s492_s5 = inlined_call_operand.hbm [shape: f32[128,128], index: 5, kind: input, shape index: {}]   ;;  %s493_s6 = inlined_call_operand.vmem [shape: f32[1,128], index: 6, kind: input, shape index: {}]   ;;  %s494_s7 = inlined_call_operand.hbm [shape: f32[16,128], index: 7, kind: output, shape index: {}]  }
   0x1   :  { %13 = vsyncpa [#allocation6], 0 }
   0x2   :  { %14 = vsyncpa [#allocation9], 0 }
   0x3   :  { %15 = vsyncpa [#allocation4], 0  ;;  %s33_s26 = sshll.u32 %s488_s1, 4  ;;  %s399_s27 = smov [#allocation5]   ;;  %s34_s26 = int_to_ptr.hbm [resolvable:$true] %s33_s26 }
   0x4   :  { %s35_s28 = sshll.u32 %s399_s27, 4  ;;  %s20_s8 = sshll.u32 %s487_s0, 4  ;;  %s36_s28 = int_to_ptr.vmem [resolvable:$true] %s35_s28  ;;  %s21_s8 = int_to_ptr.hbm [resolvable:$true] %s20_s8 }
   0x5   :  { %s400_s9 = smov 128   ;;  %s401_s10 = smov 8  }
   0x6   :  { %41 = dma.hbm_to_vmem [thread:$0]  %s34_s26, 512, %s36_s28, [#allocation6], %s400_s9, %s400_s9, %s401_s10  }
   0x7   :  { %s402_s11 = smov [#allocation2]   ;;  %s48_s1 = sshll.u32 %s490_s3, 4  ;;  %s49_s1 = int_to_ptr.hbm [resolvable:$true] %s48_s1 }
   0x8   :  { %s22_s12 = sshll.u32 %s402_s11, 4  ;;  %s63_s16 = sshll.u32 %s492_s5, 4  ;;  %s23_s12 = int_to_ptr.vmem [resolvable:$true] %s22_s12  ;;  %s64_s16 = int_to_ptr.hbm [resolvable:$true] %s63_s16 }
   0x9   :  { %28 = dma.hbm_to_vmem [thread:$0]  %s21_s8, 256, %s23_s12, [#allocation3], %s400_s9, %s400_s9, %s401_s10  }
   0xa   :  { %s403_s17 = smov [#allocation7]   ;;  %s404_s19 = smov [#allocation8]  }
   0xb   :  { %s50_s18 = sshll.u32 %s403_s17, 4  ;;  %s65_s3 = sshll.u32 %s404_s19, 4  ;;  %s51_s18 = int_to_ptr.vmem [resolvable:$true] %s50_s18  ;;  %s66_s3 = int_to_ptr.vmem [resolvable:$true] %s65_s3 }
   0xc   :  { %56 = dma.hbm_to_vmem [thread:$0]  %s49_s1, 2048, %s51_s18, [#allocation6], %s400_s9, %s400_s9, %s401_s10  }
   0xd   :  { %71 = dma.hbm_to_vmem [thread:$0]  %s64_s16, 2048, %s66_s3, [#allocation9], %s400_s9, %s400_s9, %s401_s10  }
   0xe   :  { %391 = dma.done.wait [#allocation3], 256  }
   0xf   :  { %392 = vsyncadd [#allocation3], 4294967040 }
  0x10   :  { %393 = dma.done.wait [#allocation6], 2560  }
  0x11   :  { %394 = vsyncadd [#allocation6], 4294964736 }
  0x12   :  { %395 = dma.done.wait [#allocation9], 2048  }
  0x13   :  { %396 = vsyncadd [#allocation9], 4294965248  ;;  %v95_v0 = vld [vmem:[#allocation5 + $0x18] sm:$0xff]  ;;  %v94_v1 = vld [vmem:[#allocation5 + $0x10] sm:$0xff]  ;;  %vm100_vm0 = vcmask 261120   ;;  %s405_s24 = smov [#allocation10]  }
  0x14   :  { %119 = vmatpush.msra.mxu0 %v95_v0  ;;  %v93_v2 = vld [vmem:[#allocation5 + $0x8] sm:$0xff]  ;;  %v147_v3 = vld [vmem:[#allocation7 + $0x78] sm:$0xff]  ;;  %v146_v4 = vld [vmem:[#allocation7 + $0x70] sm:$0xff]  ;;  %s226_s25 = sshll.u32 %s405_s24, 4  ;;  %s227_s25 = int_to_ptr.vmem [resolvable:$true] %s226_s25 }
  0x15   :  { %152 = vmatpush.msra.mxu1 %v147_v3  ;;  %v92_v5 = vld [vmem:[#allocation5] sm:$0xff]  ;;  %v145_v6 = vld [vmem:[#allocation7 + $0x68] sm:$0xff]  ;;  %245 = vmatpush.msra.mxu3 %v147_v3  ;;  %v90_v7 = vld [vmem:[#allocation2] sm:$0xff] }
  0x16   :  { %120 = vmatpush.msra.mxu0 %v94_v1  ;;  %v144_v8 = vld [vmem:[#allocation7 + $0x60] sm:$0xff]  ;;  %v143_v9 = vld [vmem:[#allocation7 + $0x58] sm:$0xff]  ;;  %v142_v10 = vld [vmem:[#allocation7 + $0x50] sm:$0xff] }
  0x17   :  { %153 = vmatpush.msra.mxu1 %v146_v4  ;;  %246 = vmatpush.msra.mxu3 %v146_v4  ;;  %v141_v11 = vld [vmem:[#allocation7 + $0x48] sm:$0xff]  ;;  %v91_v12 = vld [vmem:[#allocation2 + $0x8] sm:$0xff]  ;;  %v140_v13 = vld [vmem:[#allocation7 + $0x40] sm:$0xff] }
  0x18   :  { %121 = vmatpush.msra.mxu0 %v93_v2  ;;  %v139_v14 = vld [vmem:[#allocation7 + $0x38] sm:$0xff]  ;;  %v138_v15 = vld [vmem:[#allocation7 + $0x30] sm:$0xff]  ;;  %v137_v16 = vld [vmem:[#allocation7 + $0x28] sm:$0xff] }
  0x19   :  { %154 = vmatpush.msra.mxu1 %v145_v6  ;;  %247 = vmatpush.msra.mxu3 %v145_v6  ;;  %v136_v17 = vld [vmem:[#allocation7 + $0x20] sm:$0xff]  ;;  %v135_v18 = vld [vmem:[#allocation7 + $0x18] sm:$0xff]  ;;  %v134_v19 = vld [vmem:[#allocation7 + $0x10] sm:$0xff] }
  0x1a   :  { %122 = vmatpush.msra.mxu0 %v92_v5  ;;  %v133_v20 = vld [vmem:[#allocation7 + $0x8] sm:$0xff]  ;;  %v132_v21 = vld [vmem:[#allocation7] sm:$0xff]  ;;  %v192_v22 = vld [vmem:[#allocation8 + $0x78] sm:$0xff] }
  0x1b   :  { %243 = vmatmul.msk.f32.vlgmr.msra.gmra.mxu0 %vm100_vm0, %v90_v7  ;;  %155 = vmatpush.msra.mxu1 %v144_v8  ;;  %v191_v23 = vld [vmem:[#allocation8 + $0x70] sm:$0xff]  ;;  %v190_v24 = vld [vmem:[#allocation8 + $0x68] sm:$0xff]  ;;  %v189_v25 = vld [vmem:[#allocation8 + $0x60] sm:$0xff] }
  0x1c   :  { %248 = vmatpush.msra.mxu3 %v144_v8  ;;  %197 = vmatpush.msra.mxu2 %v192_v22  ;;  %v188_v26 = vld [vmem:[#allocation8 + $0x58] sm:$0xff]  ;;  %v187_v27 = vld [vmem:[#allocation8 + $0x50] sm:$0xff]  ;;  %v186_v28 = vld [vmem:[#allocation8 + $0x48] sm:$0xff] }
  0x1d   :  { %156 = vmatpush.msra.mxu1 %v143_v9  ;;  %v185_v29 = vld [vmem:[#allocation8 + $0x40] sm:$0xff]  ;;  %v184_v30 = vld [vmem:[#allocation8 + $0x38] sm:$0xff]  ;;  %v268_v31 = vld [vmem:[%s489_s2] ss:$0 sm:$0xff] }
  0x1e   :  { %249 = vmatpush.msra.mxu3 %v143_v9  ;;  %198 = vmatpush.msra.mxu2 %v191_v23  ;;  %v183_v32 = vld [vmem:[#allocation8 + $0x30] sm:$0xff]  ;;  %v182_v33 = vld [vmem:[#allocation8 + $0x28] sm:$0xff]  ;;  %v181_v36 = vld [vmem:[#allocation8 + $0x20] sm:$0xff] }
  0x1f   :  { %157 = vmatpush.msra.mxu1 %v142_v10  ;;  %v180_v38 = vld [vmem:[#allocation8 + $0x18] sm:$0xff]  ;;  %v179_v42 = vld [vmem:[#allocation8 + $0x10] sm:$0xff]  ;;  %v178_v43 = vld [vmem:[#allocation8 + $0x8] sm:$0xff] }
  0x20   :  { %250 = vmatpush.msra.mxu3 %v142_v10  ;;  %199 = vmatpush.msra.mxu2 %v190_v24  ;;  %v177_v44 = vld [vmem:[#allocation8] sm:$0xff]  ;;  %v269_v45 = vld [vmem:[%s491_s4] ss:$0 sm:$0xff]  ;;  %s228_s4 = sshll.u32 %s494_s7, 4  ;;  %s229_s4 = int_to_ptr.hbm [resolvable:$true] %s228_s4 }
  0x21   :  { %158 = vmatpush.msra.mxu1 %v141_v11  ;;  %v270_v52 = vld [vmem:[%s493_s6] ss:$0 sm:$0xff] }
  0x22   :  { %251 = vmatpush.msra.mxu3 %v141_v11  ;;  %200 = vmatpush.msra.mxu2 %v189_v25 }
  0x23   :  { %244 = vmatmul.msk.f32.gmra.mxu0 %vm100_vm0, %v91_v12  ;;  %159 = vmatpush.msra.mxu1 %v140_v13 }
  0x24   :  { %252 = vmatpush.msra.mxu3 %v140_v13  ;;  %201 = vmatpush.msra.mxu2 %v188_v26 }
  0x25   :  { %160 = vmatpush.msra.mxu1 %v139_v14 }
  0x26   :  { %253 = vmatpush.msra.mxu3 %v139_v14  ;;  %202 = vmatpush.msra.mxu2 %v187_v27 }
  0x27   :  { %161 = vmatpush.msra.mxu1 %v138_v15 }
  0x28   :  { %254 = vmatpush.msra.mxu3 %v138_v15  ;;  %203 = vmatpush.msra.mxu2 %v186_v28 }
  0x29   :  { %162 = vmatpush.msra.mxu1 %v137_v16 }
  0x2a   :  { %255 = vmatpush.msra.mxu3 %v137_v16  ;;  %204 = vmatpush.msra.mxu2 %v185_v29 }
  0x2b   :  { %163 = vmatpush.msra.mxu1 %v136_v17 }
  0x2c   :  { %256 = vmatpush.msra.mxu3 %v136_v17  ;;  %205 = vmatpush.msra.mxu2 %v184_v30 }
  0x2d   :  { %164 = vmatpush.msra.mxu1 %v135_v18 }
  0x2e   :  { %257 = vmatpush.msra.mxu3 %v135_v18  ;;  %206 = vmatpush.msra.mxu2 %v183_v32 }
  0x2f   :  { %165 = vmatpush.msra.mxu1 %v134_v19 }
  0x30   :  { %258 = vmatpush.msra.mxu3 %v134_v19  ;;  %207 = vmatpush.msra.mxu2 %v182_v33 }
  0x31   :  { %166 = vmatpush.msra.mxu1 %v133_v20 }
  0x32   :  { %259 = vmatpush.msra.mxu3 %v133_v20  ;;  %208 = vmatpush.msra.mxu2 %v181_v36 }
  0x33   :  { %167 = vmatpush.msra.mxu1 %v132_v21 }
  0x34   :  { %260 = vmatpush.msra.mxu3 %v132_v21  ;;  %209 = vmatpush.msra.mxu2 %v180_v38 }
  0x36   :  { %210 = vmatpush.msra.mxu2 %v179_v42 }
  0x38   :  { %211 = vmatpush.msra.mxu2 %v178_v43 }
  0x3a   :  { %212 = vmatpush.msra.mxu2 %v177_v44 }
  0x98   :  { %v124_v34 = vpop.f32.mrf.mxu0 }
  0x99   :  { %v125_v35 = vadd.f32 %v268_v31, %v124_v34 }
  0x9b   :  { %v130_v37 = vmax.f32 %v125_v35, 0.0 }
  0x9d   :  { %168 = vmatmul.f32.vlgmr.msra.gmra.mxu1 %v130_v37 }
  0xa0   :  { %v127_v39 = vpop.f32.mrf.mxu0 }
  0xa1   :  { %v128_v40 = vadd.f32 %v268_v31, %v127_v39 }
  0xa3   :  { %v131_v41 = vmax.f32 %v128_v40, 0.0 }
  0xa5   :  { %171 = vmatmul.f32.vlgmr.msra.gmra.mxu3 %v131_v41 }
 0x11a   :  { %v169_v46 = vpop.f32.mrf.mxu1 }
 0x11b   :  { %v170_v47 = vadd.f32 %v269_v45, %v169_v46 }
 0x11d   :  { %v175_v48 = vmax.f32 %v170_v47, 0.0 }
 0x11f   :  { %213 = vmatmul.f32.vlgmr.msra.gmra.mxu2 %v175_v48 }
 0x128   :  { %v172_v49 = vpop.f32.mrf.mxu3 }
 0x129   :  { %v173_v50 = vadd.f32 %v269_v45, %v172_v49 }
 0x12b   :  { %v176_v51 = vmax.f32 %v173_v50, 0.0 }
 0x12d   :  { %216 = vmatmul.f32.gmra.mxu2 %v176_v51 }
 0x1a2   :  { %v214_v53 = vpop.f32.mrf.mxu2 }
 0x1a3   :  { %v215_v54 = vadd.f32 %v270_v52, %v214_v53 }
 0x1a5   :  { %220 = vst [vmem:[#allocation10] sm:$0xff] %v215_v54 }
 0x1b0   :  { %v217_v55 = vpop.f32.mrf.mxu2 }
 0x1b1   :  { %v218_v56 = vadd.f32 %v270_v52, %v217_v55 }
 0x1b3   :  { %221 = vst [vmem:[#allocation10 + $0x8] sm:$0xff] %v218_v56 }
 0x1b4   :  { %234 = dma.vmem_to_hbm [thread:$0]  %s227_s25, 256, %s229_s4, [#allocation4], %s400_s9, %s400_s9, %s401_s10  }
 0x1b5   :  { %397 = dma.done.wait [#allocation4], 256  }
 0x1b6   :  { %398 = vsyncadd [#allocation4], 4294967040 }
 0x1b7   :  { %239 = vsyncpa [#allocation3], 1 }
 0x1b8   :  { %240 = vsyncpa [#allocation6], 1 }
 0x1b9   :  { %241 = vsyncpa [#allocation9], 1 }
 0x1ba   :  { %242 = vsyncpa [#allocation4], 1 }

</bundles_post_ra>
